<compile_context>
chip_gen: v7x
topology: tpu7x:2x2x1
jax: 0.10.0
libtpu: 0.0.40
codegen_flags: <defaults>
</compile_context>

<pallas_src>
import math

import jax
import jax.numpy as jnp
import numpy as np
from jax import lax
from jax.experimental import pallas as pl
from jax.experimental.pallas import tpu as pltpu


def _pe2d_kernel(pos_ref, fmat_ref, phase_ref, out_ref):
    # pos_ref:   (TILE, 2r)    packed positions, r points per row (x,y interleaved)
    # fmat_ref:  (2r,  r*C)    block-diagonal frequency matrix (C = 4F)
    # phase_ref: (1,   r*C)    0 on sin lanes, pi/2 on cos lanes
    # out_ref:   (TILE, r*C)   packed embeddings, r points per row
    ang = jnp.dot(
        pos_ref[...],
        fmat_ref[...],
        preferred_element_type=jnp.float32,
        precision=lax.Precision.HIGHEST,   # keep the angle at full f32 accuracy
    )
    # One full-width sin gives both sin and cos lanes and both x/y halves.
    out_ref[...] = jnp.sin(ang + phase_ref[...])


def _round_up(x: int, m: int) -> int:
    return ((x + m - 1) // m) * m


def _build_tables(num_channels: int, r: int):
    # Deterministic "parameter" from __init__:
    # inv_freq = 1 / 10000 ** (arange(0, C/2, 2) / C * 2)
    steps = np.arange(0.0, num_channels / 2.0, 2.0, dtype=np.float32)
    inv_freq = (1.0 / (10000.0 ** (steps / num_channels * 2.0))).astype(np.float32)
    f = inv_freq.shape[0]
    c = 4 * f                                                    # per-point embedding width

    freq_rep = np.repeat(inv_freq, 2).astype(np.float32)         # f0 f0 f1 f1 ...
    zeros = np.zeros(2 * f, dtype=np.float32)
    a_row = np.concatenate([freq_rep, zeros])                    # x half active
    b_row = np.concatenate([zeros, freq_rep])                    # y half active
    p_row = np.tile(np.array([0.0, np.pi / 2.0], np.float32), 2 * f)  # sin / cos phase

    # Block-diagonal frequency matrix: packed pos row = [x0,y0,x1,y1,...],
    # packed out row = [emb(pt0) | emb(pt1) | ...].
    fmat = np.zeros((2 * r, r * c), dtype=np.float32)
    for j in range(r):
        fmat[2 * j, j * c:(j + 1) * c] = a_row
        fmat[2 * j + 1, j * c:(j + 1) * c] = b_row
    phase = np.tile(p_row, r)[None, :]                           # (1, r*c)
    return fmat, phase, c


def positional_encoding_2d(pos: jax.Array, num_channels: int, *, max_tile_rows: int | None = None) -> jax.Array:
    """pos: (N, 2) float32 -> (N, 4*len(inv_freq)) float32."""
    assert pos.ndim == 2 and pos.shape[1] == 2
    pos = pos.astype(jnp.float32)
    n = pos.shape[0]

    # Per-point embedding width C and the row-packing factor r (r*C % 128 == 0).
    steps = np.arange(0.0, num_channels / 2.0, 2.0, dtype=np.float32)
    c = 4 * int(steps.shape[0])
    r = 128 // math.gcd(c, 128)
    fmat, phase, _ = _build_tables(num_channels, r)
    cc = r * c                                                   # packed output width

    # Pad point count only to the packing factor r (and to >= 8 packed rows
    # for tiny inputs) -- NOT to a full tile.  Ragged last grid blocks are
    # masked by Pallas, so no full-output out[:n] copy when n % r == 0.
    n_pad = _round_up(n, r)
    packed_n = n_pad // r
    if packed_n < 8:                                             # tiny-N robustness; copy is negligible here
        packed_n = 8
        n_pad = packed_n * r
    if n_pad != n:
        pos = jnp.pad(pos, ((0, n_pad - n), (0, 0)))
    pos_packed = pos.reshape(packed_n, 2 * r)                    # free row-major reinterpret

    # Tile sizing: ~4 MiB output blocks to amortize per-step pipeline overhead;
    # double-buffered (out + lane-padded pos) blocks stay ~16 MiB, below the
    # 32 MiB scoped VMEM limit we request (fits v5e/v6e/v7x).
    out_block_target = 4 << 20
    rows = max(8, (out_block_target // (cc * 4)) // 8 * 8)
    if max_tile_rows is not None:
        rows = max(8, min(rows, (max_tile_rows // 8) * 8))
    tile = packed_n if packed_n <= rows else rows                # full dim or multiple of 8
    grid = (pl.cdiv(packed_n, tile),)

    out_packed = pl.pallas_call(
        _pe2d_kernel,
        out_shape=jax.ShapeDtypeStruct((packed_n, cc), jnp.float32),
        grid=grid,
        in_specs=[
            pl.BlockSpec((tile, 2 * r), lambda i: (i, 0)),
            pl.BlockSpec((2 * r, cc), lambda i: (0, 0)),         # tiny constant table, resident block
            pl.BlockSpec((1, cc), lambda i: (0, 0)),
        ],
        out_specs=pl.BlockSpec((tile, cc), lambda i: (i, 0)),
        compiler_params=pltpu.CompilerParams(
            dimension_semantics=("parallel",),
            vmem_limit_bytes=32 * 1024 * 1024,
        ),
    )(pos_packed, jnp.asarray(fmat), jnp.asarray(phase))

    out = out_packed.reshape(n_pad, c)                           # free (same row-major layout)
    return out if n_pad == n else out[:n]


def _reference(pos, num_channels):
    steps = np.arange(0.0, num_channels / 2.0, 2.0, dtype=np.float32)
    inv_freq = (1.0 / (10000.0 ** (steps / num_channels * 2.0))).astype(np.float32)
    pos_x, pos_y = pos[:, 0], pos[:, 1]
    sin_inp_x = jnp.einsum("i,j->ij", pos_x, inv_freq)
    sin_inp_y = jnp.einsum("i,j->ij", pos_y, inv_freq)

    def get_emb(sin_inp):
        emb = jnp.stack((jnp.sin(sin_inp), jnp.cos(sin_inp)), axis=-1)
        return emb.reshape(emb.shape[0], -1)

    return jnp.concatenate([get_emb(sin_inp_x), get_emb(sin_inp_y)], axis=-1)


if __name__ == "__main__":
    num_channels = 32   # -> F = 8, per-point output dim = 32, packing factor r = 4

    # Case 1: aligned, single block.
    pos = jax.random.uniform(jax.random.PRNGKey(0), (64, 2), dtype=jnp.float32) * 16.0
    out = jax.block_until_ready(positional_encoding_2d(pos, num_channels))
    ref = _reference(pos, num_channels)
    assert out.shape == ref.shape, (out.shape, ref.shape)
    np.testing.assert_allclose(np.asarray(out), np.asarray(ref), rtol=1e-5, atol=3e-5)

    # Case 2: multi-step grid with a ragged last block (exercises masked writeback).
    pos2 = jax.random.uniform(jax.random.PRNGKey(1), (300, 2), dtype=jnp.float32) * 16.0
    out2 = jax.block_until_ready(positional_encoding_2d(pos2, num_channels, max_tile_rows=16))
    ref2 = _reference(pos2, num_channels)
    assert out2.shape == ref2.shape, (out2.shape, ref2.shape)
    np.testing.assert_allclose(np.asarray(out2), np.asarray(ref2), rtol=1e-5, atol=3e-5)

    # Case 3: N not a multiple of the packing factor (exercises the small pad + slice path).
    pos3 = jax.random.uniform(jax.random.PRNGKey(2), (13, 2), dtype=jnp.float32) * 16.0
    out3 = jax.block_until_ready(positional_encoding_2d(pos3, num_channels))
    ref3 = _reference(pos3, num_channels)
    assert out3.shape == ref3.shape, (out3.shape, ref3.shape)
    np.testing.assert_allclose(np.asarray(out3), np.asarray(ref3), rtol=1e-5, atol=3e-5)

    print("KERNEL_OK")
</pallas_src>

<mosaic_0001>
module attributes {stable_mosaic.version = 11 : i64} {
  func.func @_pe2d_kernel(%arg0: i32, %arg1: memref<16x8xf32, #tpu.memory_space<vmem>>, %arg2: memref<8x128xf32, #tpu.memory_space<vmem>>, %arg3: memref<1x128xf32, #tpu.memory_space<vmem>>, %arg4: memref<16x128xf32, #tpu.memory_space<vmem>>) attributes {dimension_semantics = [#tpu.dimension_semantics<parallel>], iteration_bounds = array<i64: 1>, scalar_prefetch = 0 : i64, scratch_operands = 0 : i64, tpu.core_type = #tpu.core_type<tc>, window_params = [{transform_indices = @transform_0, window_bounds = array<i64: 16, 8>}, {pipeline_mode = #tpu.pipeline_mode<synchronous>, transform_indices = @transform_1, window_bounds = array<i64: 8, 128>}, {pipeline_mode = #tpu.pipeline_mode<synchronous>, transform_indices = @transform_2, window_bounds = array<i64: 1, 128>}, {transform_indices = @transform_3, window_bounds = array<i64: 16, 128>}]} {
    %c0 = arith.constant 0 : index
    %c0_0 = arith.constant 0 : index
    %0 = vector.load %arg1[%c0, %c0_0] : memref<16x8xf32, #tpu.memory_space<vmem>>, vector<16x8xf32>
    %c0_1 = arith.constant 0 : index
    %c0_2 = arith.constant 0 : index
    %1 = vector.load %arg2[%c0_1, %c0_2] : memref<8x128xf32, #tpu.memory_space<vmem>>, vector<8x128xf32>
    %cst = arith.constant dense<0.000000e+00> : vector<16x128xf32>
    %2 = tpu.matmul %0, %1, %cst {dimension_numbers = #tpu.dot_dimension_numbers<[1], [0], [0], [1], [0, 0, 1, 1], [], []>, precision = #tpu.contract_precision<fp32>} : vector<16x8xf32>, vector<8x128xf32>, vector<16x128xf32> -> vector<16x128xf32>
    %c0_3 = arith.constant 0 : index
    %c0_4 = arith.constant 0 : index
    %3 = vector.load %arg3[%c0_3, %c0_4] : memref<1x128xf32, #tpu.memory_space<vmem>>, vector<1x128xf32>
    %4 = vector.broadcast %3 : vector<1x128xf32> to vector<16x128xf32>
    %5 = arith.addf %2, %4 : vector<16x128xf32>
    %6 = math.sin %5 : vector<16x128xf32>
    %c0_5 = arith.constant 0 : index
    %c0_6 = arith.constant 0 : index
    %7 = vector.load %arg4[%c0_5, %c0_6] : memref<16x128xf32, #tpu.memory_space<vmem>>, vector<16x128xf32>
    tpu.vector_store %arg4[%c0_5, %c0_6], %6 {strides = array<i32>} : memref<16x128xf32, #tpu.memory_space<vmem>>, vector<16x128xf32>,
    return
  }
  func.func @transform_0(%arg0: i32) -> (i32, i32) {
    %c0_i32 = arith.constant 0 : i32
    %c0_i32_0 = arith.constant 0 : i32
    return %arg0, %c0_i32 : i32, i32
  }
  func.func @transform_1(%arg0: i32) -> (i32, i32) {
    %c0_i32 = arith.constant 0 : i32
    %c0_i32_0 = arith.constant 0 : i32
    %c0_i32_1 = arith.constant 0 : i32
    return %c0_i32, %c0_i32_0 : i32, i32
  }
  func.func @transform_2(%arg0: i32) -> (i32, i32) {
    %c0_i32 = arith.constant 0 : i32
    %c0_i32_0 = arith.constant 0 : i32
    %c0_i32_1 = arith.constant 0 : i32
    return %c0_i32, %c0_i32_0 : i32, i32
  }
  func.func @transform_3(%arg0: i32) -> (i32, i32) {
    %c0_i32 = arith.constant 0 : i32
    %c0_i32_0 = arith.constant 0 : i32
    return %arg0, %c0_i32 : i32, i32
  }
}

</mosaic_0001>

<bundles_post_ra>
// kernel: tpu_custom_call.1
= control target key start
LH: loop header
LB: loop body
LE: loop exit
PB: predicated region body
PF: predicated region fallthrough
CT: control target
= control target key end

     0   :  { %vm25_vm0 = vcmask 64512   ;;  %s980_s0 = inlined_call_operand.vmem [shape: f32[16,8], index: 0, kind: input, shape index: {}]   ;;  %s981_s1 = inlined_call_operand.vmem [shape: f32[8,128], index: 1, kind: input, shape index: {}]   ;;  %s982_s2 = inlined_call_operand.vmem [shape: f32[1,128], index: 2, kind: input, shape index: {}]   ;;  %s983_s3 = inlined_call_operand.hbm [shape: f32[16,128], index: 3, kind: output, shape index: {}]  }
   0x1   :  { %v17_v0 = vld [vmem:[%s981_s1] sm:$0xff]  ;;  %v16_v2 = vld [vmem:[%s980_s0 + $0x8] sm:$0xff] }
   0x2   :  { %v15_v1 = vld [vmem:[%s980_s0] sm:$0xff]  ;;  %v33_v3 = vand.u32 4294901760, %v17_v0  ;;  %v30_v5 = vsel %vm25_vm0, %v16_v2, 0 }
   0x3   :  { %v27_v4 = vsel %vm25_vm0, %v15_v1, 0 }
   0x4   :  { %8 = vsyncpa [#allocation3], 0  ;;  %v98_v6 = vand.u32 4294901760, %v27_v4  ;;  %v108_v7 = vand.u32 4294901760, %v30_v5  ;;  %789 = vmatprep.subr.mxu0 %v33_v3  ;;  %774 = vmatprep.subr.mxu1 %v33_v3  ;;  %v120_v8 = vsub.f32 %v17_v0, %v33_v3  ;;  %v747_v22 = vld [vmem:[%s982_s2] ss:$0 sm:$0xff] }
   0x5   :  { %790 = vmatpush3.msra.mxu0 %v33_v3  ;;  %775 = vmatpush3.msra.mxu1 %v33_v3  ;;  %v865_v49 = vmov 683565275   ;;  %v866_v53 = vmov 2475754826   ;;  %v867_v55 = vmov 2131351028  }
   0x6   :  { %v99_v9 = vsub.f32 %v27_v4, %v98_v6  ;;  %v109_v10 = vsub.f32 %v30_v5, %v108_v7  ;;  %v121_v11 = vand.u32 4294901760, %v120_v8  ;;  %v868_v57 = vmov 2102212464   ;;  %s871_s2 = smov [#allocation2]  }
   0x7   :  { %v869_v59 = vmov 920167782   ;;  %v870_v2 = vmov 1326507024   ;;  %s736_s18 = sshll.u32 %s871_s2, 4  ;;  %s737_s18 = int_to_ptr.vmem [resolvable:$true] %s736_s18 }
   0x8   :  { %v100_v12 = vand.u32 4294901760, %v99_v9  ;;  %v110_v13 = vand.u32 4294901760, %v109_v10  ;;  %v122_v14 = vsub.f32 %v120_v8, %v121_v11  ;;  %794 = vmatprep.subr.mxu0 %v121_v11  ;;  %s841_s19 = scalar_lea.vmem %s737_s18, 256  ;;  %p846_p1 = scmp.lt.s32.totalorder %s737_s18, %s737_s18 }
   0x9   :  { %p842_p0 = scmp.ne.s32.totalorder %s737_s18, %s841_s19  ;;  %p847_p2 = scmp.lt.s32.totalorder %s841_s19, %s841_s19 }
   0xa   :  { %791 = vmatprep.mubr.f32.mxu0 %v100_v12  ;;  %v101_v15 = vsub.f32 %v99_v9, %v100_v12  ;;  %v111_v16 = vsub.f32 %v109_v10, %v110_v13  ;;  %v123_v17 = vand.u32 4294901760, %v122_v14 }
   0xb   :  { %792 = vmatmul.mubr.f32.vlgmr.msra.gmra.mrb[0].mxu0 %v110_v13  ;;  %p848_p3 = por %p847_p2, %p846_p1 }
   0xc   :  { %v102_v18 = vand.u32 4294901760, %v101_v15  ;;  %v112_v19 = vand.u32 4294901760, %v111_v16  ;;  %795 = vmatpush3.msra.mxu0 %v121_v11  ;;  %796 = vmatprep.mubr.f32.mxu0 %v98_v6 }
   0xd   :  { %779 = vmatprep.subr.mxu1 %v123_v17  ;;  %799 = vmatprep.subr.mxu0 %v33_v3  ;;  %p849_p4 = pnand %p848_p3, %p842_p0 }
   0xe   :  { %776 = vmatprep.mubr.f32.mxu1 %v102_v18 }
   0xf   :  { %777 = vmatmul.mubr.f32.vlgmr.msra.gmra.mrb[0].mxu1 %v112_v19 }
  0x10   :  { %780 = vmatpush3.msra.mxu1 %v123_v17  ;;  %781 = vmatprep.mubr.f32.mxu1 %v98_v6 }
  0x11   :  { %784 = vmatprep.subr.mxu1 %v120_v8 }
  0x13   :  { %797 = vmatmul.mubr.f32.vlgmr.msra.gmra.mrb[0].mxu0 %v108_v7 }
  0x14   :  { %800 = vmatpush3.msra.mxu0 %v33_v3  ;;  %801 = vmatprep.mubr.f32.mxu0 %v98_v6 }
  0x17   :  { %782 = vmatmul.mubr.f32.vlgmr.msra.gmra.mrb[0].mxu1 %v108_v7 }
  0x18   :  { %785 = vmatpush3.msra.mxu1 %v120_v8  ;;  %786 = vmatprep.mubr.f32.mxu1 %v99_v9 }
  0x1b   :  { %802 = vmatmul.mubr.f32.vlgmr.msra.gmra.mrb[0].mxu0 %v108_v7 }
  0x1f   :  { %787 = vmatmul.mubr.f32.vlgmr.msra.gmra.mrb[0].mxu1 %v109_v10 }
  0xee   :  { %v803_v20 = vpop.f32.mrb[0].mxu0 }
  0xef   :  { %v511_v21 = vpop.f32.mrb[1].mxu0 }
  0xf2   :  { %v788_v23 = vpop.f32.mrb[0].mxu1 }
  0xf3   :  { %v804_v24 = vadd.f32 %v788_v23, %v747_v22  ;;  %v270_v25 = vpop.f32.mrb[1].mxu1 }
  0xf4   :  { %v806_v26 = vadd.f32 %v747_v22, %v270_v25 }
  0xf5   :  { %v906_v27 = vadd.f32 %v804_v24, %v803_v20 }
  0xf6   :  { %v908_v28 = vadd.f32 %v806_v26, %v511_v21 }
  0xf7   :  { %v625_v29 = vand.u32 2147483647, %v906_v27  ;;  %v628_v30 = vand.u32 2139095040, %v906_v27  ;;  %vm627_vm15 = vcmp.lt.s32.totalorder %v906_v27, 0 }
  0xf8   :  { %v524_v31 = vand.u32 2139095040, %v908_v28  ;;  %v521_v34 = vand.u32 2147483647, %v908_v28 }
  0xf9   :  { %v629_v32 = vshrl.u32 %v628_v30, 23  ;;  %v632_v33 = vand.u32 8388607, %v625_v29  ;;  %vm626_vm0 = vcmp.le.f32.partialorder %v625_v29, 0.7853982 }
  0xfa   :  { %v525_v35 = vshrl.u32 %v524_v31, 23  ;;  %v918_v40 = vand.u32 8388607, %v521_v34 }
  0xfb   :  { %v752_v36 = vadd.s32 4294967169, %v629_v32  ;;  %v633_v39 = vor.u32 8388608, %v632_v33 }
  0xfc   :  { %v748_v37 = vadd.s32 4294967169, %v525_v35  ;;  %v529_v47 = vor.u32 8388608, %v918_v40 }
  0xfd   :  { %v635_v38 = vadd.s32 1, %v752_v36  ;;  %v920_v46 = vshll.u32 %v633_v39, 8 }
  0xfe   :  { %v531_v41 = vadd.s32 1, %v748_v37 }
  0xff   :  { %vm636_vm1 = vcmp.gt.s32.totalorder %v635_v38, 0 }
 0x100   :  { %v637_v42 = vsel %vm636_vm1, %v635_v38, 0  ;;  %vm532_vm2 = vcmp.gt.s32.totalorder %v531_v41, 0  ;;  %vm523_vm1 = vcmp.lt.s32.totalorder %v908_v28, 0 }
 0x101   :  { %v638_v43 = vshrl.u32 %v637_v42, 5  ;;  %v639_v44 = vand.u32 31, %v637_v42  ;;  %v533_v45 = vsel %vm532_vm2, %v531_v41, 0  ;;  %v569_v41 = vshll.u32 %v529_v47, 8 }
 0x102   :  { %v923_v51 = vshrl.u32 %v533_v45, 5  ;;  %v535_v52 = vand.u32 31, %v533_v45  ;;  %vm522_vm2 = vcmp.le.f32.partialorder %v521_v34, 0.7853982 }
 0x103   :  { %v640_v48 = vsub.s32 32, %v639_v44  ;;  %v642_v50 = vshll.u32 %v865_v49, %v639_v44  ;;  %v645_v54 = vshll.u32 %v866_v53, %v639_v44  ;;  %v648_v56 = vshll.u32 %v867_v55, %v639_v44 }
 0x104   :  { %v651_v58 = vshll.u32 %v868_v57, %v639_v44  ;;  %v654_v60 = vshll.u32 %v869_v59, %v639_v44  ;;  %vm657_vm3 = vcmp.lt.s32.totalorder %v638_v43, 1  ;;  %vm658_vm4 = vcmp.lt.s32.totalorder %v638_v43, 2 }
 0x105   :  { %v643_v61 = vshrl.u32 %v866_v53, %v640_v48  ;;  %v646_v62 = vshrl.u32 %v867_v55, %v640_v48  ;;  %v649_v63 = vshrl.u32 %v868_v57, %v640_v48  ;;  %v641_v0 = vshrl.u32 %v865_v49, %v640_v48 }
 0x106   :  { %v652_v1 = vshrl.u32 %v869_v59, %v640_v48  ;;  %v655_v3 = vshrl.u32 %v870_v2, %v640_v48  ;;  %v536_v7 = vsub.s32 32, %v535_v52  ;;  %vm659_vm5 = vcmp.lt.s32.totalorder %v638_v43, 3 }
 0x107   :  { %v644_v4 = vor.u32 %v643_v61, %v642_v50  ;;  %v647_v5 = vor.u32 %v646_v62, %v645_v54  ;;  %v650_v6 = vor.u32 %v649_v63, %v648_v56  ;;  %vm660_vm6 = vcmp.lt.s32.totalorder %v638_v43, 4 }
 0x108   :  { %v653_v8 = vor.u32 %v652_v1, %v651_v58  ;;  %v656_v9 = vor.u32 %v655_v3, %v654_v60  ;;  %v538_v17 = vshll.u32 %v865_v49, %v535_v52  ;;  %v539_v20 = vshrl.u32 %v866_v53, %v536_v7 }
 0x109   :  { %v661_v10 = vsel %vm657_vm3, %v641_v0, %v644_v4  ;;  %v662_v11 = vsel %vm660_vm6, %v650_v6, 2102212464  ;;  %v665_v12 = vsel %vm657_vm3, %v644_v4, %v647_v5  ;;  %v669_v13 = vsel %vm657_vm3, %v647_v5, %v650_v6 }
 0x10a   :  { %v663_v14 = vsel %vm659_vm5, %v647_v5, %v662_v11  ;;  %v666_v15 = vsel %vm660_vm6, %v653_v8, 920167782  ;;  %v670_v16 = vsel %vm660_vm6, %v656_v9, 1326507024  ;;  %v541_v21 = vshll.u32 %v866_v53, %v535_v52 }
 0x10b   :  { %v667_v18 = vsel %vm659_vm5, %v650_v6, %v666_v15  ;;  %v671_v19 = vsel %vm659_vm5, %v653_v8, %v670_v16  ;;  %v664_v22 = vsel %vm658_vm4, %v661_v10, %v663_v14  ;;  %v542_v25 = vshrl.u32 %v867_v55, %v536_v7 }
 0x10c   :  { %v668_v23 = vsel %vm658_vm4, %v665_v12, %v667_v18  ;;  %v672_v24 = vsel %vm658_vm4, %v669_v13, %v671_v19  ;;  %v540_v33 = vor.u32 %v539_v20, %v538_v17  ;;  %v544_v36 = vshll.u32 %v867_v55, %v535_v52 }
 0x10d   :  { %v932_v26 = vmul.u32.u64.low %v920_v46, %v672_v24  ;;  %v933_v30 = vmul.u32.u64.high %v920_v46, %v672_v24, %v932_v26  ;;  %v936_v31 = vmul.u32.u64.low %v920_v46, %v668_v23  ;;  %v937_v32 = vmul.u32.u64.high %v920_v46, %v668_v23, %v936_v31 }
 0x10e   :  { %v543_v35 = vor.u32 %v542_v25, %v541_v21  ;;  %v545_v37 = vshrl.u32 %v868_v57, %v536_v7  ;;  %v547_v38 = vshll.u32 %v868_v57, %v535_v52  ;;  %v548_v39 = vshrl.u32 %v869_v59, %v536_v7 }
 0x10f   :  { %v551_v40 = vshrl.u32 %v870_v2, %v536_v7  ;;  %v680_v42 = vmul.u32 %v920_v46, %v664_v22  ;;  %v537_v43 = vshrl.u32 %v865_v49, %v536_v7  ;;  %v550_v45 = vshll.u32 %v869_v59, %v535_v52 }
 0x110   :  { %v546_v44 = vor.u32 %v545_v37, %v544_v36  ;;  %vm682_vm7 = vc.u32 %v933_v30, %v936_v31  ;;  %v683_v48 = vadd.s32 1, %v937_v32  ;;  %v549_v50 = vor.u32 %v548_v39, %v547_v38 }
 0x111   :  { %vm553_vm8 = vcmp.lt.s32.totalorder %v923_v51, 1  ;;  %v552_v53 = vor.u32 %v551_v40, %v550_v45  ;;  %vm555_vm9 = vcmp.lt.s32.totalorder %v923_v51, 3  ;;  %vm556_vm10 = vcmp.lt.s32.totalorder %v923_v51, 4 }
 0x112   :  { %v561_v54 = vsel %vm553_vm8, %v540_v33, %v543_v35  ;;  %v684_v47 = vsel %vm682_vm7, %v683_v48, %v937_v32  ;;  %v558_v55 = vsel %vm556_vm10, %v546_v44, 2102212464  ;;  %v562_v46 = vsel %vm556_vm10, %v549_v50, 920167782 }
 0x113   :  { %v565_v49 = vsel %vm553_vm8, %v543_v35, %v546_v44  ;;  %v685_v56 = vadd.s32 %v684_v47, %v680_v42  ;;  %vm554_vm11 = vcmp.lt.s32.totalorder %v923_v51, 2  ;;  %v563_v52 = vsel %vm555_vm9, %v546_v44, %v562_v46 }
 0x114   :  { %v566_v57 = vsel %vm556_vm10, %v552_v53, 1326507024  ;;  %v557_v58 = vsel %vm553_vm8, %v537_v43, %v540_v33  ;;  %v559_v59 = vsel %vm555_vm9, %v543_v35, %v558_v55  ;;  %v564_v60 = vsel %vm554_vm11, %v561_v54, %v563_v52 }
 0x115   :  { %v567_v61 = vsel %vm555_vm9, %v549_v50, %v566_v57  ;;  %v686_v62 = vadd.s32 536870912, %v685_v56  ;;  %v947_v0 = vmul.u32.u64.low %v569_v41, %v564_v60  ;;  %v948_v1 = vmul.u32.u64.high %v569_v41, %v564_v60, %v947_v0 }
 0x116   :  { %v568_v63 = vsel %vm554_vm11, %v565_v49, %v567_v61  ;;  %v560_v5 = vsel %vm554_vm11, %v557_v58, %v559_v59  ;;  %v681_v21 = vadd.s32 %v936_v31, %v933_v30  ;;  %vm717_vm6 = vweird.f32 %v906_v27 }
 0x117   :  { %v950_v2 = vmul.u32.u64.low %v569_v41, %v568_v63  ;;  %v951_v3 = vmul.u32.u64.high %v569_v41, %v568_v63, %v950_v2  ;;  %v687_v4 = vshrl.u32 %v686_v62, 30  ;;  %v579_v7 = vadd.s32 1, %v948_v1 }
 0x118   :  { %v576_v51 = vmul.u32 %v569_v41, %v560_v5  ;;  %vm613_vm10 = vweird.f32 %v908_v28 }
 0x119   :  { %v688_v6 = vshll.u32 %v687_v4, 30  ;;  %vm578_vm12 = vc.u32 %v951_v3, %v947_v0  ;;  %v577_v42 = vadd.s32 %v947_v0, %v951_v3  ;;  %v711_v31 = vsub.s32 4, %v687_v4 }
 0x11a   :  { %v580_v9 = vsel %vm578_vm12, %v579_v7, %v948_v1 }
 0x11b   :  { %v689_v8 = vsub.s32 %v685_v56, %v688_v6  ;;  %v581_v10 = vadd.s32 %v580_v9, %v576_v51  ;;  %v712_v46 = vsel %vm627_vm15, %v711_v31, %v687_v4 }
 0x11c   :  { %v714_v58 = vsel %vm626_vm0, 0, %v712_v46 }
 0x11d   :  { %v691_v11 = vsub.s32 0, %v689_v8  ;;  %v582_v12 = vadd.s32 536870912, %v581_v10  ;;  %v718_v61 = vadd.s32 3, %v714_v58 }
 0x11f   :  { %v753_v13 = vmin.u32 %v691_v11, %v689_v8  ;;  %v583_v14 = vshrl.u32 %v582_v12, 30  ;;  %v719_v1 = vand.u32 3, %v718_v61 }
 0x121   :  { %v693_v15 = vclz %v753_v13  ;;  %v584_v16 = vshll.u32 %v583_v14, 30  ;;  %v607_v60 = vsub.s32 4, %v583_v14  ;;  %vm724_vm3 = vcmp.eq.s32.totalorder %v719_v1, 2 }
 0x122   :  { %vm721_vm4 = vcmp.eq.s32.totalorder %v719_v1, 0  ;;  %vm720_vm5 = vcmp.lt.s32.totalorder %v719_v1, 2 }
 0x123   :  { %v754_v17 = vadd.s32 4294967294, %v693_v15  ;;  %v585_v18 = vsub.s32 %v581_v10, %v584_v16  ;;  %v608_v63 = vsel %vm523_vm1, %v607_v60, %v583_v14 }
 0x124   :  { %v610_v3 = vsel %vm522_vm2, 0, %v608_v63 }
 0x125   :  { %vm755_vm13 = vcmp.lt.s32.totalorder %v754_v17, 0  ;;  %v587_v20 = vsub.s32 0, %v585_v18  ;;  %v614_v7 = vadd.s32 3, %v610_v3 }
 0x126   :  { %v696_v19 = vsel %vm755_vm13, 0, %v754_v17 }
 0x127   :  { %v697_v22 = vsub.s32 32, %v696_v19  ;;  %v701_v23 = vsub.s32 4294967266, %v696_v19  ;;  %v749_v24 = vmin.u32 %v587_v20, %v585_v18  ;;  %v698_v25 = vshll.u32 %v689_v8, %v696_v19 }
 0x128   :  { %v615_v10 = vand.u32 3, %v614_v7 }
 0x129   :  { %v699_v26 = vshrl.u32 %v681_v21, %v697_v22  ;;  %v702_v32 = vadd.s32 127, %v701_v23  ;;  %v589_v33 = vclz %v749_v24 }
 0x12a   :  { %vm620_vm7 = vcmp.eq.s32.totalorder %v615_v10, 2  ;;  %vm617_vm8 = vcmp.eq.s32.totalorder %v615_v10, 0  ;;  %vm616_vm9 = vcmp.lt.s32.totalorder %v615_v10, 2 }
 0x12b   :  { %v700_v35 = vor.u32 %v699_v26, %v698_v25  ;;  %v703_v36 = vshll.u32 %v702_v32, 23  ;;  %v750_v37 = vadd.s32 4294967294, %v589_v33 }
 0x12d   :  { %v704_v38 = vor.u32 4788187, %v703_v36  ;;  %vm751_vm14 = vcmp.lt.s32.totalorder %v750_v37, 0  ;;  %v707_v40 = vcvt.s32.f32 %v700_v35 }
 0x12e   :  { %v592_v41 = vsel %vm751_vm14, 0, %v750_v37 }
 0x12f   :  { %v705_v39 = vand.u32 2147483647, %v704_v38  ;;  %v593_v43 = vsub.s32 32, %v592_v41  ;;  %v597_v44 = vsub.s32 4294967266, %v592_v41  ;;  %v594_v45 = vshll.u32 %v585_v18, %v592_v41 }
 0x131   :  { %v708_v30 = vmul.f32 %v707_v40, %v705_v39  ;;  %v595_v48 = vshrl.u32 %v577_v42, %v593_v43  ;;  %v598_v50 = vadd.s32 127, %v597_v44 }
 0x133   :  { %v709_v53 = vxor.u32 2147483648, %v708_v30  ;;  %v596_v54 = vor.u32 %v595_v48, %v594_v45  ;;  %v599_v47 = vshll.u32 %v598_v50, 23 }
 0x135   :  { %v710_v55 = vsel %vm627_vm15, %v709_v53, %v708_v30  ;;  %v600_v56 = vor.u32 4788187, %v599_v47  ;;  %v603_v57 = vcvt.s32.f32 %v596_v54 }
 0x136   :  { %v713_v49 = vsel %vm626_vm0, %v906_v27, %v710_v55 }
 0x137   :  { %833 = vcosq.f32 %v713_v49  ;;  %v601_v52 = vand.u32 2147483647, %v600_v56 }
 0x138   :  { %835 = vsinq.f32 %v713_v49 }
 0x139   :  { %v604_v59 = vmul.f32 %v603_v57, %v601_v52 }
 0x13b   :  { %v605_v62 = vxor.u32 2147483648, %v604_v59 }
 0x13d   :  { %v606_v29 = vsel %vm523_vm1, %v605_v62, %v604_v59 }
 0x13e   :  { %v609_v0 = vsel %vm522_vm2, %v908_v28, %v606_v29 }
 0x13f   :  { %837 = vcosq.f32 %v609_v0 }
 0x140   :  { %839 = vsinq.f32 %v609_v0 }
 0x141   :  { %v834_v2 = vpop.eup %833 }
 0x142   :  { %v836_v4 = vpop.eup %835  ;;  %v725_v5 = vxor.u32 2147483648, %v834_v2 }
 0x143   :  { %v722_v6 = vxor.u32 2147483648, %v836_v4 }
 0x144   :  { %v726_v51 = vsel %vm724_vm3, %v725_v5, %v836_v4 }
 0x145   :  { %v723_v8 = vsel %vm721_vm4, %v834_v2, %v722_v6 }
 0x146   :  { %v727_v34 = vsel %vm720_vm5, %v723_v8, %v726_v51 }
 0x147   :  { %v728_v9 = vsel %vm717_vm6, nan, %v727_v34 }
 0x148   :  { %730 = vst [vmem:[#allocation2 + $0x8] sm:$0xff] %v728_v9 }
 0x149   :  { %v838_v11 = vpop.eup %837 }
 0x14a   :  { %v840_v12 = vpop.eup %839  ;;  %v621_v13 = vxor.u32 2147483648, %v838_v11 }
 0x14b   :  { %v618_v14 = vxor.u32 2147483648, %v840_v12 }
 0x14c   :  { %v622_v15 = vsel %vm620_vm7, %v621_v13, %v840_v12 }
 0x14d   :  { %v619_v16 = vsel %vm617_vm8, %v838_v11, %v618_v14 }
 0x14e   :  { %v623_v17 = vsel %vm616_vm9, %v619_v16, %v622_v15 }
 0x14f   :  { %v624_v27 = vsel %vm613_vm10, nan, %v623_v17 }
 0x150   :  { %729 = vst [vmem:[#allocation2] sm:$0xff] %v624_v27 }
 0x151   :  { %852 = shalt.err (!%p849_p4)
}
 0x152   :  { %s853_s22 = scalar_lea.hbm %s983_s3, 256 }
 0x153   :  { %p854_p5 = scmp.ne.s32.totalorder %s983_s3, %s853_s22  ;;  %p857_p6 = scmp.lt.u32.totalorder %s853_s22, %s983_s3 }
 0x155   :  { %p859_p7 = pnand %p857_p6, %p854_p5 }
 0x157   :  { %862 = shalt.err (!%p859_p7)
}
 0x158   :  { %s872_s27 = smov 128   ;;  %s873_s28 = smov 8  }
 0x159   :  { %742 = dma.vmem_to_hbm [thread:$0]  %s737_s18, 256, %s983_s3, [#allocation3], %s872_s27, %s872_s27, %s873_s28  }
 0x15a   :  { %863 = dma.done.wait [#allocation3], 256  }
 0x15b   :  { %864 = vsyncadd [#allocation3], 4294967040 }
 0x15c   :  { %746 = vsyncpa [#allocation3], 1 }

</bundles_post_ra>
